<compile_context>
chip_gen: v7x
topology: tpu7x:2x2x1
jax: 0.10.0
libtpu: 0.0.40
codegen_flags: <defaults>
</compile_context>

<pallas_src>
import functools

import jax
import jax.numpy as jnp
from jax.experimental import pallas as pl
from jax.experimental.pallas import tpu as pltpu


def _ls_ce_kernel(preds_ref, golds_ref, out_ref, sum_acc, cnt_acc, *,
                  eps, ignore_id, n_class, n_tiles, tiles_per_core,
                  guard_oob, chunk_w):
    c = pl.program_id(0)          # core-split axis ("parallel")
    j = pl.program_id(1)          # this core's tile index ("arbitrary")

    @pl.when(j == 0)
    def _init():
        sum_acc[...] = jnp.zeros_like(sum_acc)
        cnt_acc[...] = jnp.zeros_like(cnt_acc)

    def _compute():
        g = golds_ref[...]                              # (tile_n, 1) int32
        gold = jnp.where(g != ignore_id, g, 0)          # ignored rows -> class 0
        tile_n = g.shape[0]

        # Running per-row state (all (tile_n, 1) f32, held across chunks).
        # Finite init (not -inf) avoids inf-inf NaNs on the very first chunk.
        m0 = jnp.full((tile_n, 1), -1e30, jnp.float32)
        z0 = jnp.zeros((tile_n, 1), jnp.float32)

        def one_chunk(state, xc_native, base):
            """Online {max, sum_exp, sum_x, x_gold} update for one lane chunk."""
            m, s, sx, xg = state
            xc = xc_native.astype(jnp.float32)          # only (tile_n, cw), not (tile_n, V)
            cm = jnp.max(xc, axis=1, keepdims=True)
            m_new = jnp.maximum(m, cm)
            s = s * jnp.exp(m - m_new) + jnp.sum(jnp.exp(xc - m_new),
                                                 axis=1, keepdims=True)
            lane = jax.lax.broadcasted_iota(jnp.int32, xc.shape, 1) + base
            xg = xg + jnp.sum(jnp.where(lane == gold, xc, 0.0),
                              axis=1, keepdims=True)
            if eps != 0.0:
                # Fused sum(x) in the same pass (smoothing path only).
                sx = sx + jnp.sum(xc, axis=1, keepdims=True)
            return (m_new, s, sx, xg)

        # Static (fully unrolled) chunk loop over the class axis.  chunk_w is a
        # multiple of 128 (or == V), so every chunk load is lane-aligned; the
        # wrapper bounds the chunk count so the unroll stays small.
        state = (m0, z0, z0, z0)
        n_chunks = (n_class + chunk_w - 1) // chunk_w
        for ci in range(n_chunks):
            base = ci * chunk_w
            w = min(chunk_w, n_class - base)
            state = one_chunk(state, preds_ref[:, base:base + w], base)

        m, s, sx, xg = state
        lse = jnp.log(s) + m                            # (tile_n, 1)
        lp_gold = xg - lse                              # log_softmax at gold id

        if eps == 0.0:
            # Plain cross entropy (ignore_index + mean handled by the masks).
            row_loss = -lp_gold
        else:
            # sum_k lp[k] = sum_k x[k] - V * lse  (no second pass over lp)
            lp_sum = sx - n_class * lse
            row_loss = -((1.0 - eps) * lp_gold
                         + (eps / n_class) * (lp_sum - lp_gold))

        non_pad = g != ignore_id                        # (tile_n, 1) bool
        # Use where (not multiply): rows past N in a ragged last tile may
        # contain garbage (inf/NaN) in preds; where keeps them at exactly 0,
        # and no cross-row reduction happens before this mask.
        sum_acc[...] += jnp.sum(jnp.where(non_pad, row_loss, 0.0),
                                keepdims=True)
        cnt_acc[...] += jnp.sum(non_pad.astype(jnp.float32), keepdims=True)

    if guard_oob:
        # Steps whose tile index falls past the real tile count do nothing.
        pl.when(c * tiles_per_core + j < n_tiles)(_compute)
    else:
        _compute()

    @pl.when(j == pl.num_programs(1) - 1)
    def _finalize():
        lane = jax.lax.broadcasted_iota(jnp.int32, out_ref.shape, 1)
        s_b = jnp.broadcast_to(sum_acc[...], out_ref.shape)
        n_b = jnp.broadcast_to(cnt_acc[...], out_ref.shape)
        out_ref[...] = jnp.where(lane == 0, s_b,
                                 jnp.where(lane == 1, n_b, 0.0))


def _num_tensorcores():
    """Best-effort TensorCore-per-chip count; defaults to 1 (v5e/v6e)."""
    try:
        info = pltpu.get_tpu_info()
        for name in ("num_tensorcores", "tensorcore_count", "num_cores",
                     "cores_per_chip"):
            v = getattr(info, name, None)
            if isinstance(v, int) and v > 0:
                return int(v)
    except Exception:
        pass
    return 1


def _vmem_capacity_bytes():
    try:
        return int(pltpu.get_tpu_info().vmem_capacity_bytes)
    except Exception:
        return 64 * 1024 * 1024   # v7x per-TC VMEM (conservative default)


def label_smoothing_cross_entropy(preds, golds, ratio, *, ignore_id,
                                  smoothing=0.0, tile_n=None, chunk_w=512):
    """Pallas-TPU forward of LabelSmoothingCrossEntropy.

    preds: (B, T, V) float (f32 or bf16, kept in its native dtype in HBM)
    golds: (B, T) int class ids;  ratio: scalar.
    Precondition (same as the PyTorch module): at least one gold != ignore_id,
    otherwise the mean is 0/0 (NaN), exactly like torch.
    """
    B, T, V = preds.shape
    N = B * T
    preds2 = preds.reshape(N, V)                       # no cast, no pad copy
    golds2 = golds.reshape(N, 1).astype(jnp.int32)

    # Only if the whole problem is smaller than one minimal 16-row tile do we
    # pad preds at all (the copy is then trivially small).
    if N < 16:
        preds2 = jnp.pad(preds2, ((0, 16 - N), (0, 0)))
        golds2 = jnp.pad(golds2, ((0, 16 - N), (0, 0)),
                         constant_values=ignore_id)
        N = 16

    # ---- class-axis chunk width: multiple of 128 (or == V), bounded unroll.
    if V <= chunk_w:
        cw = V
    else:
        cw = max(128, (int(chunk_w) // 128) * 128)
        max_chunks = 64
        if (V + cw - 1) // cw > max_chunks:
            cw = (((V + max_chunks - 1) // max_chunks) + 127) // 128 * 128

    # ---- VMEM budgeting (per-row working set, conservative):
    #   double-buffered native-dtype preds block
    # + per-chunk f32 temporaries (cast / exp / compare / select)
    # + lane-padded (tile_n, 1) running state, loss temps and gold block.
    itemsize = preds2.dtype.itemsize
    per_row = 2 * V * itemsize + 5 * cw * 4 + 14 * 128 * 4

    vmem_cap = _vmem_capacity_bytes()
    if 16 * per_row + (2 << 20) > vmem_cap * 9 // 10:
        raise ValueError(
            f"n_class={V} is too large for a 16-row tile within "
            f"{vmem_cap >> 20} MiB of VMEM; reduce chunk_w or split the vocab.")
    vmem_limit = min(vmem_cap * 3 // 4, 96 * 1024 * 1024)

    if tile_n is None:
        t = (vmem_limit - (2 << 20)) // per_row
        t = min(t, 8192)                       # byte-sized, not a hard 1024 cap
        t = (t // 16) * 16                     # bf16 needs sublane multiple of 16
        tile_n = max(16, min(t, max(16, (N // 16) * 16)))
    else:
        tile_n = max(16, (int(tile_n) // 16) * 16)
        tile_n = min(tile_n, max(16, (N // 16) * 16))

    # Never let the (16-row) floor silently overshoot the declared VMEM limit.
    est = tile_n * per_row + (2 << 20)
    vmem_limit = min(max(vmem_limit, est), vmem_cap * 9 // 10)

    n_tiles = (N + tile_n - 1) // tile_n
    # 2-way core split only on multi-TensorCore chips (v7x); on 1-TC v5e/v6e
    # the grid is a sequential loop and the split would be pure overhead.
    # TODO(synk): verify v7x actually shards the leading axis across both TCs
    # (else switch to pltpu.CORE_PARALLEL / pl.core_map) once a v7x is at hand.
    n_cores = 2 if (_num_tensorcores() >= 2 and n_tiles >= 2) else 1
    tiles_per_core = (n_tiles + n_cores - 1) // n_cores
    guard_oob = (n_cores * tiles_per_core != n_tiles)

    # golds is tiny: pad it so every tile's gold block is in-bounds and the
    # padded rows carry ignore_id (this also masks any garbage preds rows in
    # the ragged last tile — preds itself is never padded).
    n_pad = n_tiles * tile_n - N
    if n_pad:
        golds2 = jnp.pad(golds2, ((0, n_pad), (0, 0)),
                         constant_values=ignore_id)

    if guard_oob:
        def row_block(c, jj):
            return (jnp.minimum(c * tiles_per_core + jj, n_tiles - 1), 0)
    else:
        def row_block(c, jj):
            return (c * tiles_per_core + jj, 0)

    kernel = functools.partial(
        _ls_ce_kernel,
        eps=float(smoothing), ignore_id=int(ignore_id), n_class=int(V),
        n_tiles=int(n_tiles), tiles_per_core=int(tiles_per_core),
        guard_oob=bool(guard_oob), chunk_w=int(cw))

    cost = pl.CostEstimate(
        flops=int(8 * N * V),
        transcendentals=int(N * V),
        bytes_accessed=int(N * V * itemsize + N * 8 + n_cores * 8 * 128 * 4))

    partials = pl.pallas_call(
        kernel,
        out_shape=jax.ShapeDtypeStruct((n_cores * 8, 128), jnp.float32),
        grid_spec=pltpu.PrefetchScalarGridSpec(
            num_scalar_prefetch=0,
            grid=(n_cores, tiles_per_core),
            in_specs=[
                pl.BlockSpec((tile_n, V), row_block),   # preds rows (native dtype)
                pl.BlockSpec((tile_n, 1), row_block),   # gold ids
            ],
            out_specs=pl.BlockSpec((8, 128), lambda c, jj: (c, 0)),
            scratch_shapes=[
                pltpu.VMEM((1, 1), jnp.float32),   # lane-dense loss partial
                pltpu.VMEM((1, 1), jnp.float32),   # lane-dense word count
            ],
        ),
        compiler_params=pltpu.CompilerParams(
            dimension_semantics=("parallel", "arbitrary"),
            vmem_limit_bytes=int(vmem_limit)),
        cost_estimate=cost,
    )(preds2, golds2)

    total = jnp.sum(partials[0::8, 0])
    n_word = jnp.sum(partials[0::8, 1])
    return jnp.asarray(ratio, jnp.float32) * total / n_word


def _reference(preds, golds, ratio, *, ignore_id, smoothing):
    """Pure-JAX reference mirroring the PyTorch module (both branches)."""
    B, T, V = preds.shape
    p = preds.reshape(-1, V).astype(jnp.float32)
    g = golds.reshape(-1)
    eps = smoothing
    gold_scatter = jnp.where(g != ignore_id, g, 0)
    one_hot = jax.nn.one_hot(gold_scatter, V, dtype=jnp.float32)
    one_hot = one_hot * (1 - eps) + (1 - one_hot) * eps / V
    log_prb = jax.nn.log_softmax(p, axis=1)
    non_pad = g != ignore_id
    n_word = jnp.sum(non_pad)
    loss = -jnp.sum(one_hot * log_prb, axis=1)
    loss = jnp.sum(jnp.where(non_pad, loss, 0.0)) / n_word
    return ratio * loss


if __name__ == "__main__":
    IGNORE_ID = -1
    ratio = 0.7

    key = jax.random.PRNGKey(0)
    k1, k2, k3, k4 = jax.random.split(key, 4)
    ok = True

    # Case 1: N = 200 rows, V = 64 — exercises the ragged last tile, multi-tile
    # accumulation and both smoothing branches (single-chunk class loop).
    B, T, V = 4, 50, 64
    preds = jax.random.normal(k1, (B, T, V), dtype=jnp.float32)
    golds = jax.random.randint(k2, (B, T), 0, V, dtype=jnp.int32)
    golds = golds.at[0, 0].set(IGNORE_ID).at[1, 3].set(IGNORE_ID)
    golds = golds.at[3, 49].set(IGNORE_ID)

    for smoothing in (0.1, 0.0):
        ref = _reference(preds, golds, ratio, ignore_id=IGNORE_ID,
                         smoothing=smoothing)
        # Small explicit tile -> many grid steps (multi-tile / tail paths).
        loss_small = jax.block_until_ready(label_smoothing_cross_entropy(
            preds, golds, ratio, ignore_id=IGNORE_ID, smoothing=smoothing,
            tile_n=16))
        # Auto-sized tile (the fast production path).
        loss_auto = jax.block_until_ready(label_smoothing_cross_entropy(
            preds, golds, ratio, ignore_id=IGNORE_ID, smoothing=smoothing))
        ok &= bool(jnp.allclose(loss_small, ref, rtol=1e-5, atol=1e-5))
        ok &= bool(jnp.allclose(loss_auto, ref, rtol=1e-5, atol=1e-5))

    # Case 2: bf16 logits stay bf16 in HBM (half the DMA bytes); in-kernel
    # per-chunk upcast to f32.
    preds_bf16 = preds.astype(jnp.bfloat16)
    ref_bf = _reference(preds_bf16, golds, ratio, ignore_id=IGNORE_ID,
                        smoothing=0.1)
    loss_bf = jax.block_until_ready(label_smoothing_cross_entropy(
        preds_bf16, golds, ratio, ignore_id=IGNORE_ID, smoothing=0.1))
    ok &= bool(jnp.allclose(loss_bf, ref_bf, rtol=1e-4, atol=1e-4))

    # Case 3: V = 300 with chunk_w = 128 — exercises the multi-chunk class
    # loop (two aligned 128-lane chunks + a ragged 44-lane tail) and the
    # online-logsumexp chunk carry.
    B2, T2, V2 = 2, 30, 300
    preds3 = jax.random.normal(k3, (B2, T2, V2), dtype=jnp.float32)
    golds3 = jax.random.randint(k4, (B2, T2), 0, V2, dtype=jnp.int32)
    golds3 = golds3.at[0, 0].set(IGNORE_ID)
    ref3 = _reference(preds3, golds3, ratio, ignore_id=IGNORE_ID,
                      smoothing=0.1)
    loss3 = jax.block_until_ready(label_smoothing_cross_entropy(
        preds3, golds3, ratio, ignore_id=IGNORE_ID, smoothing=0.1,
        chunk_w=128))
    ok &= bool(jnp.allclose(loss3, ref3, rtol=1e-5, atol=1e-5))

    assert ok, "mismatch vs reference"
    print("KERNEL_OK")
</pallas_src>

<mosaic_0001>
module attributes {stable_mosaic.version = 11 : i64} {
  func.func @_ls_ce_kernel(%arg0: i32, %arg1: i32, %arg2: memref<16x64xf32, #tpu.memory_space<vmem>>, %arg3: memref<16x1xi32, #tpu.memory_space<vmem>>, %arg4: memref<8x128xf32, #tpu.memory_space<vmem>>, %arg5: memref<1x1xf32, #tpu.memory_space<vmem>>, %arg6: memref<1x1xf32, #tpu.memory_space<vmem>>) attributes {dimension_semantics = [#tpu.dimension_semantics<parallel>, #tpu.dimension_semantics<arbitrary>], iteration_bounds = array<i64: 1, 13>, scalar_prefetch = 0 : i64, scratch_operands = 2 : i64, tpu.core_type = #tpu.core_type<tc>, window_params = [{transform_indices = @transform_0, window_bounds = array<i64: 16, 64>}, {transform_indices = @transform_1, window_bounds = array<i64: 16, 1>}, {transform_indices = @transform_2, window_bounds = array<i64: 8, 128>}]} {
    %c0_i32 = arith.constant 0 : i32
    %0 = arith.cmpi eq, %arg1, %c0_i32 : i32
    %1 = arith.extui %0 : i1 to i32
    %c0_i32_0 = arith.constant 0 : i32
    %2 = arith.cmpi ne, %1, %c0_i32_0 : i32
    scf.if %2 {
      %cst_29 = arith.constant 0.000000e+00 : f32
      %75 = vector.broadcast %cst_29 : f32 to vector<1x1xf32>
      %c0_30 = arith.constant 0 : index
      %c0_31 = arith.constant 0 : index
      %76 = vector.load %arg5[%c0_30, %c0_31] : memref<1x1xf32, #tpu.memory_space<vmem>>, vector<1x1xf32>
      tpu.vector_store %arg5[%c0_30, %c0_31], %75 {strides = array<i32>} : memref<1x1xf32, #tpu.memory_space<vmem>>, vector<1x1xf32>,
      %cst_32 = arith.constant 0.000000e+00 : f32
      %77 = vector.broadcast %cst_32 : f32 to vector<1x1xf32>
      %c0_33 = arith.constant 0 : index
      %c0_34 = arith.constant 0 : index
      %78 = vector.load %arg6[%c0_33, %c0_34] : memref<1x1xf32, #tpu.memory_space<vmem>>, vector<1x1xf32>
      tpu.vector_store %arg6[%c0_33, %c0_34], %77 {strides = array<i32>} : memref<1x1xf32, #tpu.memory_space<vmem>>, vector<1x1xf32>,
    } else {
    }
    %c0 = arith.constant 0 : index
    %c0_1 = arith.constant 0 : index
    %3 = vector.load %arg3[%c0, %c0_1] : memref<16x1xi32, #tpu.memory_space<vmem>>, vector<16x1xi32>
    %c-1_i32 = arith.constant -1 : i32
    %4 = vector.broadcast %c-1_i32 : i32 to vector<16x1xi32>
    %5 = arith.cmpi ne, %3, %4 : vector<16x1xi32>
    %c0_i32_2 = arith.constant 0 : i32
    %6 = vector.broadcast %c0_i32_2 : i32 to vector<16x1xi32>
    %7 = arith.select %5, %3, %6 : vector<16x1xi1>, vector<16x1xi32>
    %cst = arith.constant -1.000000e+30 : f32
    %8 = vector.broadcast %cst : f32 to vector<16x1xf32>
    %cst_3 = arith.constant 0.000000e+00 : f32
    %9 = vector.broadcast %cst_3 : f32 to vector<16x1xf32>
    %c0_4 = arith.constant 0 : index
    %c0_5 = arith.constant 0 : index
    %10 = vector.load %arg2[%c0_4, %c0_5] : memref<16x64xf32, #tpu.memory_space<vmem>>, vector<16x64xf32>
    %cst_6 = arith.constant dense<0xFF800000> : vector<16xf32>
    %11 = vector.multi_reduction <maximumf>, %10, %cst_6 [1] : vector<16x64xf32> to vector<16xf32>
    %12 = vector.shape_cast %11 : vector<16xf32> to vector<16x1xf32>
    %13 = arith.maximumf %8, %12 : vector<16x1xf32>
    %14 = arith.subf %8, %13 : vector<16x1xf32>
    %15 = math.exp %14 : vector<16x1xf32>
    %16 = arith.mulf %9, %15 : vector<16x1xf32>
    %17 = vector.broadcast %13 : vector<16x1xf32> to vector<16x64xf32>
    %18 = arith.subf %10, %17 : vector<16x64xf32>
    %19 = math.exp %18 : vector<16x64xf32>
    %cst_7 = arith.constant dense<0.000000e+00> : vector<16xf32>
    %20 = vector.multi_reduction <add>, %19, %cst_7 [1] : vector<16x64xf32> to vector<16xf32>
    %21 = vector.shape_cast %20 : vector<16xf32> to vector<16x1xf32>
    %22 = arith.addf %16, %21 : vector<16x1xf32>
    %23 = tpu.iota {dimensions = array<i32: 1>} : vector<16x64xi32>
    %c0_i32_8 = arith.constant 0 : i32
    %24 = vector.broadcast %c0_i32_8 : i32 to vector<16x64xi32>
    %25 = arith.addi %23, %24 : vector<16x64xi32>
    %26 = vector.broadcast %7 : vector<16x1xi32> to vector<16x64xi32>
    %27 = arith.cmpi eq, %25, %26 : vector<16x64xi32>
    %cst_9 = arith.constant 0.000000e+00 : f32
    %28 = vector.broadcast %cst_9 : f32 to vector<16x64xf32>
    %29 = arith.select %27, %10, %28 : vector<16x64xi1>, vector<16x64xf32>
    %cst_10 = arith.constant dense<0.000000e+00> : vector<16xf32>
    %30 = vector.multi_reduction <add>, %29, %cst_10 [1] : vector<16x64xf32> to vector<16xf32>
    %31 = vector.shape_cast %30 : vector<16xf32> to vector<16x1xf32>
    %32 = arith.addf %9, %31 : vector<16x1xf32>
    %cst_11 = arith.constant dense<0.000000e+00> : vector<16xf32>
    %33 = vector.multi_reduction <add>, %10, %cst_11 [1] : vector<16x64xf32> to vector<16xf32>
    %34 = vector.shape_cast %33 : vector<16xf32> to vector<16x1xf32>
    %35 = arith.addf %9, %34 : vector<16x1xf32>
    %36 = math.log %22 : vector<16x1xf32>
    %37 = arith.addf %36, %13 : vector<16x1xf32>
    %38 = arith.subf %32, %37 : vector<16x1xf32>
    %cst_12 = arith.constant 6.400000e+01 : f32
    %39 = vector.broadcast %cst_12 : f32 to vector<16x1xf32>
    %40 = arith.mulf %39, %37 : vector<16x1xf32>
    %41 = arith.subf %35, %40 : vector<16x1xf32>
    %cst_13 = arith.constant 0.899999976 : f32
    %42 = vector.broadcast %cst_13 : f32 to vector<16x1xf32>
    %43 = arith.mulf %42, %38 : vector<16x1xf32>
    %44 = arith.subf %41, %38 : vector<16x1xf32>
    %cst_14 = arith.constant 1.562500e-03 : f32
    %45 = vector.broadcast %cst_14 : f32 to vector<16x1xf32>
    %46 = arith.mulf %45, %44 : vector<16x1xf32>
    %47 = arith.addf %43, %46 : vector<16x1xf32>
    %cst_15 = arith.constant 0.000000e+00 : f32
    %48 = vector.broadcast %cst_15 : f32 to vector<16x1xf32>
    %49 = arith.subf %48, %47 : vector<16x1xf32>
    %c-1_i32_16 = arith.constant -1 : i32
    %50 = vector.broadcast %c-1_i32_16 : i32 to vector<16x1xi32>
    %51 = arith.cmpi ne, %3, %50 : vector<16x1xi32>
    %c0_17 = arith.constant 0 : index
    %c0_18 = arith.constant 0 : index
    %52 = vector.load %arg5[%c0_17, %c0_18] : memref<1x1xf32, #tpu.memory_space<vmem>>, vector<1x1xf32>
    %cst_19 = arith.constant 0.000000e+00 : f32
    %53 = vector.broadcast %cst_19 : f32 to vector<16x1xf32>
    %54 = arith.select %51, %49, %53 : vector<16x1xi1>, vector<16x1xf32>
    %55 = vector.shape_cast %54 : vector<16x1xf32> to vector<1x16x1xf32>
    %cst_20 = arith.constant dense<0.000000e+00> : vector<1xf32>
    %56 = vector.multi_reduction <add>, %55, %cst_20 [1, 2] : vector<1x16x1xf32> to vector<1xf32>
    %57 = vector.shape_cast %56 : vector<1xf32> to vector<1x1x1xf32>
    %58 = vector.extract %57[0, 0, 0] : f32 from vector<1x1x1xf32>
    %59 = vector.broadcast %58 : f32 to vector<1x1xf32>
    %60 = arith.addf %52, %59 : vector<1x1xf32>
    %c0_21 = arith.constant 0 : index
    %c0_22 = arith.constant 0 : index
    %61 = vector.load %arg5[%c0_21, %c0_22] : memref<1x1xf32, #tpu.memory_space<vmem>>, vector<1x1xf32>
    tpu.vector_store %arg5[%c0_21, %c0_22], %60 {strides = array<i32>} : memref<1x1xf32, #tpu.memory_space<vmem>>, vector<1x1xf32>,
    %c0_23 = arith.constant 0 : index
    %c0_24 = arith.constant 0 : index
    %62 = vector.load %arg6[%c0_23, %c0_24] : memref<1x1xf32, #tpu.memory_space<vmem>>, vector<1x1xf32>
    %63 = arith.extui %51 : vector<16x1xi1> to vector<16x1xi32>
    %64 = arith.sitofp %63 : vector<16x1xi32> to vector<16x1xf32>
    %65 = vector.shape_cast %64 : vector<16x1xf32> to vector<1x16x1xf32>
    %cst_25 = arith.constant dense<0.000000e+00> : vector<1xf32>
    %66 = vector.multi_reduction <add>, %65, %cst_25 [1, 2] : vector<1x16x1xf32> to vector<1xf32>
    %67 = vector.shape_cast %66 : vector<1xf32> to vector<1x1x1xf32>
    %68 = vector.extract %67[0, 0, 0] : f32 from vector<1x1x1xf32>
    %69 = vector.broadcast %68 : f32 to vector<1x1xf32>
    %70 = arith.addf %62, %69 : vector<1x1xf32>
    %c0_26 = arith.constant 0 : index
    %c0_27 = arith.constant 0 : index
    %71 = vector.load %arg6[%c0_26, %c0_27] : memref<1x1xf32, #tpu.memory_space<vmem>>, vector<1x1xf32>
    tpu.vector_store %arg6[%c0_26, %c0_27], %70 {strides = array<i32>} : memref<1x1xf32, #tpu.memory_space<vmem>>, vector<1x1xf32>,
    %c12_i32 = arith.constant 12 : i32
    %72 = arith.cmpi eq, %arg1, %c12_i32 : i32
    %73 = arith.extui %72 : i1 to i32
    %c0_i32_28 = arith.constant 0 : i32
    %74 = arith.cmpi ne, %73, %c0_i32_28 : i32
    scf.if %74 {
      %75 = tpu.iota {dimensions = array<i32: 1>} : vector<8x128xi32>
      %c0_29 = arith.constant 0 : index
      %c0_30 = arith.constant 0 : index
      %76 = vector.load %arg5[%c0_29, %c0_30] : memref<1x1xf32, #tpu.memory_space<vmem>>, vector<1x1xf32>
      %77 = vector.shape_cast %76 : vector<1x1xf32> to vector<1x1xf32>
      %78 = vector.broadcast %77 : vector<1x1xf32> to vector<8x128xf32>
      %c0_31 = arith.constant 0 : index
      %c0_32 = arith.constant 0 : index
      %79 = vector.load %arg6[%c0_31, %c0_32] : memref<1x1xf32, #tpu.memory_space<vmem>>, vector<1x1xf32>
      %80 = vector.shape_cast %79 : vector<1x1xf32> to vector<1x1xf32>
      %81 = vector.broadcast %80 : vector<1x1xf32> to vector<8x128xf32>
      %c0_i32_33 = arith.constant 0 : i32
      %82 = vector.broadcast %c0_i32_33 : i32 to vector<8x128xi32>
      %83 = arith.cmpi eq, %75, %82 : vector<8x128xi32>
      %c1_i32 = arith.constant 1 : i32
      %84 = vector.broadcast %c1_i32 : i32 to vector<8x128xi32>
      %85 = arith.cmpi eq, %75, %84 : vector<8x128xi32>
      %cst_34 = arith.constant 0.000000e+00 : f32
      %86 = vector.broadcast %cst_34 : f32 to vector<8x128xf32>
      %87 = arith.select %85, %81, %86 : vector<8x128xi1>, vector<8x128xf32>
      %88 = arith.select %83, %78, %87 : vector<8x128xi1>, vector<8x128xf32>
      %c0_35 = arith.constant 0 : index
      %c0_36 = arith.constant 0 : index
      %89 = vector.load %arg4[%c0_35, %c0_36] : memref<8x128xf32, #tpu.memory_space<vmem>>, vector<8x128xf32>
      tpu.vector_store %arg4[%c0_35, %c0_36], %88 {strides = array<i32>} : memref<8x128xf32, #tpu.memory_space<vmem>>, vector<8x128xf32>,
    } else {
    }
    return
  }
  func.func @transform_0(%arg0: i32, %arg1: i32) -> (i32, i32) {
    %c13_i32 = arith.constant 13 : i32
    %0 = arith.muli %arg0, %c13_i32 : i32
    %1 = arith.addi %0, %arg1 : i32
    %c0_i32 = arith.constant 0 : i32
    %c0_i32_0 = arith.constant 0 : i32
    return %1, %c0_i32 : i32, i32
  }
  func.func @transform_1(%arg0: i32, %arg1: i32) -> (i32, i32) {
    %c13_i32 = arith.constant 13 : i32
    %0 = arith.muli %arg0, %c13_i32 : i32
    %1 = arith.addi %0, %arg1 : i32
    %c0_i32 = arith.constant 0 : i32
    %c0_i32_0 = arith.constant 0 : i32
    return %1, %c0_i32 : i32, i32
  }
  func.func @transform_2(%arg0: i32, %arg1: i32) -> (i32, i32) {
    %c0_i32 = arith.constant 0 : i32
    %c0_i32_0 = arith.constant 0 : i32
    return %arg0, %c0_i32 : i32, i32
  }
}

</mosaic_0001>

<bundles_post_ra>
// kernel: tpu_custom_call.1
= control target key start
LH: loop header
LB: loop body
LE: loop exit
PB: predicated region body
PF: predicated region fallthrough
CT: control target
= control target key end

     0   :  { %7 = vsyncpa [#allocation5], 0  ;;  %s601_s9 = smov 0   ;;  %s603_s10 = smov 0   ;;  %s702_s0 = inlined_call_operand.vmem [shape: f32[200,64], index: 0, kind: input, shape index: {}]   ;;  %s703_s1 = inlined_call_operand.vmem [shape: s32[208,1], index: 1, kind: input, shape index: {}]   ;;  %s704_s2 = inlined_call_operand.hbm [shape: f32[8,128], index: 2, kind: output, shape index: {}]  }
   0x1   :  { %s605_s11 = smov 0  }
   0x2 LB: > { %s455_s12 = sadd.s32 4294967295, %s579_s11   ;;  %s22_s13 = sadd.s32 1, %s575_s10  ;;  %s579_s11 = sphi %s605_s11, %s13_s11   ;;  %s575_s10 = sphi %s603_s10, %s707_s10   ;;  %s571_s9 = sphi %s601_s9, %s706_s9  }
   0x3   : > { %p23_p0 = scmp.ge.s32.totalorder %s22_s13, 13  ;;  %p458_p1 = scmp.ge.s32.totalorder %s579_s11, 1 }
   0x4   : > { %p161_p2 = scmp.lt.s32.totalorder %s579_s11, 14 }
   0x5   : > { %s709_s13 = smov (%p23_p0, %s22_s13), 0 }
   0x6   : > { %p162_p3 = pnand %p458_p1, %p161_p2 }
   0x7   : > { %s459_s14 = sshll.u32 (!%p162_p3), %s571_s9, 1  ;;  %p463_p6 = scmp.ne.s32.totalorder (!%p162_p3), %s571_s9, 0 }
   0x8   : > { %165 = sbr.rel (%p162_p3) target bundleno = 742 (0x2e6), region = 28  ;;  %p198_p4 = scmp.lt.s32.totalorder (!%p162_p3), %s459_s14, 24 }
   0x9   : > { %p212_p5 = scmp.lt.s32.totalorder (!%p162_p3), %s459_s14, 25 }
   0xf   : > { %s199_s15 = scalar_select %p198_p4, %s459_s14, 24 }
  0x10   : > { %s711_s14 = smov (!%p212_p5, %s459_s14), 25  ;;  %222 = sbr.rel (%p463_p6) target bundleno = 23 (0x17), region = 32 }
  0x11   : > { %s460_s16 = sshll.u32 %s199_s15, 3  ;;  %s462_s20 = sshll.u32 %s711_s14, 3  ;;  %vm223_vm0 = vcmask (!%p463_p6), 0   ;;  %v581_v0 = vmov (!%p463_p6), 0.0  }
  0x12   : > { %s201_s19 = scalar_lea.vmem %s702_s0, %s460_s16  ;;  %s215_s23 = scalar_lea.vmem %s703_s1, %s462_s20  ;;  %224 = vst.msk [vmem:[#allocation2] sm:$0x1] (!%p463_p6), %vm223_vm0, %v581_v0  ;;  %225 = vst.msk [vmem:[#allocation3] sm:$0x1] (!%p463_p6), %vm223_vm0, %v581_v0 }
  0x17 PF: > { %v232_v1 = vld [vmem:[%s201_s19] sm:$0xff]  ;;  %vm234_vm1 = vcmask 523264   ;;  %v233_v2 = vld [vmem:[%s201_s19 + $0x8] sm:$0xff]  ;;  %v582_v5 = vmov 0   ;;  %v265_v16 = vlaneseq  ;;  %vm318_vm6 = vcmask 7168   ;;  %p466_p7 = scmp.ne.s32.totalorder %s571_s9, 12 }
  0x18   : > { %v630_v3 = vld [vmem:[%s215_s23] sm:$0xff]  ;;  %v235_v4 = vsel %vm234_vm1, %v232_v1, -inf  ;;  %512 = vset.pattern.permute.xlu1 %v582_v5  ;;  %v634_v6 = vld [vmem:[%s215_s23 + $0x8] sm:$0xff]  ;;  %513 = vset.pattern.permute.xlu0 %v582_v5  ;;  %v238_v8 = vsel %vm234_vm1, %v233_v2, -inf  ;;  %v285_v30 = vsel %vm234_vm1, %v232_v1, 0.0  ;;  %v288_v31 = vsel %vm234_vm1, %v233_v2, 0.0 }
  0x19   : > { %vm228_vm2 = vcmp.ne.s32.totalorder %v630_v3, 4294967295  ;;  %236 = vmax.xlane.f32.xlu0 %v235_v4  ;;  %vm229_vm3 = vcmp.ne.s32.totalorder %v634_v6, 4294967295  ;;  %v644_v20 = vand.u32 127, %v265_v16  ;;  %vm333_vm7 = vcmask 0  }
  0x1a   : > { %v230_v7 = vsel %vm228_vm2, %v630_v3, 0  ;;  %v231_v9 = vsel %vm229_vm3, %v634_v6, 0 }
  0x1b   : > { %268 = vperm.xlu1 %512, %v230_v7   ;;  %vm380_vm8 = vcmp.eq.s32.totalorder (!%p466_p7), %v644_v20, 1  ;;  %vm379_vm9 = vcmp.eq.s32.totalorder (!%p466_p7), %v644_v20, 0 }
  0x1d   : > { %239 = vmax.xlane.f32.xlu0 %v238_v8 }
  0x1f   : > { %271 = vperm.xlu1 %512, %v231_v9   ;;  %v583_v9 = vmov 0.0  }
  0x9a   : > { %v269_v19 = vpop.permute.xlu1 %268 }
  0x9b   : > { %vm273_vm4 = vcmp.eq.s32.totalorder %v644_v20, %v269_v19 }
  0x9c   : > { %v275_v23 = vsel %vm273_vm4, %v232_v1, 0.0 }
  0x9d   : > { %v277_v25 = vsel %vm234_vm1, %v275_v23, 0.0 }
  0x9e   : > { %v272_v21 = vpop.permute.xlu1 %271 }
  0x9f   : > { %vm274_vm5 = vcmp.eq.s32.totalorder %v644_v20, %v272_v21 }
  0xa0   : > { %v276_v27 = vsel %vm274_vm5, %v233_v2, 0.0 }
  0xa1   : > { %v280_v29 = vsel %vm234_vm1, %v276_v27, 0.0 }
  0xa6   : > { %v237_v10 = vpop.xlane.xlu0 %236 }
  0xa7   : > { %v241_v11 = vmax.f32 %v237_v10, -1e+30  ;;  %v464_v10 = vsel %vm228_vm2, 1.0, %v583_v9 }
  0xa9   : > { %v251_v12 = vsub.f32 %v232_v1, %v241_v11  ;;  %v243_v32 = vsub.f32 -1e+30, %v241_v11 }
  0xaa   : > { %v240_v13 = vpop.xlane.xlu0 %239 }
  0xab   : > { %v253_v14 = vmul.f32 1.442695, %v251_v12  ;;  %v242_v15 = vmax.f32 %v240_v13, -1e+30  ;;  %v245_v33 = vmul.f32 1.442695, %v243_v32 }
  0xac   : > { %v315_v32 = vld [vmem:[#allocation2] sm:$0x1] }
  0xad   : > { %514 = vpow2.f32 %v253_v14  ;;  %v252_v17 = vsub.f32 %v233_v2, %v242_v15  ;;  %v244_v34 = vsub.f32 -1e+30, %v242_v15 }
  0xaf   : > { %v255_v18 = vmul.f32 1.442695, %v252_v17  ;;  %v247_v35 = vmul.f32 1.442695, %v244_v34 }
  0xb1   : > { %516 = vpow2.f32 %v255_v18 }
  0xb2   : > { %518 = vpow2.f32 %v245_v33 }
  0xb3   : > { %520 = vpow2.f32 %v247_v35  ;;  %v335_v35 = vld [vmem:[#allocation3] sm:$0x1] }
  0xb7   : > { %v515_v22 = vpop.eup %514 }
  0xb8   : > { %v257_v24 = vsel %vm234_vm1, %v515_v22, 0.0 }
  0xb9   : > { %258 = vadd.xlane.f32.xlu0 %v257_v24 }
  0xbb   : > { %v517_v26 = vpop.eup %516 }
  0xbc   : > { %v260_v28 = vsel %vm234_vm1, %v517_v26, 0.0  ;;  %v519_v36 = vpop.eup %518 }
  0xbd   : > { %261 = vadd.xlane.f32.xlu1 %v260_v28  ;;  %278 = vadd.xlane.f32.xlu0 %v277_v25  ;;  %v249_v37 = vmul.f32 0.0, %v519_v36  ;;  %v521_v38 = vpop.eup %520 }
  0xbe   : > { %v250_v41 = vmul.f32 0.0, %v521_v38 }
  0xc1   : > { %281 = vadd.xlane.f32.xlu0 %v280_v29 }
  0xc5   : > { %286 = vadd.xlane.f32.xlu0 %v285_v30 }
  0xc9   : > { %289 = vadd.xlane.f32.xlu0 %v288_v31 }
 0x146   : > { %v259_v39 = vpop.xlane.xlu0 %258 }
 0x147   : > { %v263_v40 = vadd.f32 %v259_v39, %v249_v37  ;;  %v584_v39 = vmov (!%p466_p7), 0  }
 0x148   : > { %526 = vset.pattern.permute.xlu0 (!%p466_p7), %v584_v39 }
 0x149   : > { %522 = vlog2.f32 %v263_v40 }
 0x14a   : > { %v262_v42 = vpop.xlane.xlu1 %261  ;;  %v279_v44 = vpop.xlane.xlu0 %278 }
 0x14b   : > { %v264_v43 = vadd.f32 %v262_v42, %v250_v41 }
 0x14d   : > { %524 = vlog2.f32 %v264_v43 }
 0x14e   : > { %v282_v45 = vpop.xlane.xlu0 %281 }
 0x152   : > { %v287_v48 = vpop.xlane.xlu0 %286 }
 0x153   : > { %v523_v46 = vpop.eup %522 }
 0x154   : > { %v294_v47 = vmul.f32 0.6931472, %v523_v46 }
 0x156   : > { %v297_v49 = vadd.f32 %v294_v47, %v241_v11  ;;  %v290_v56 = vpop.xlane.xlu0 %289  ;;  %v465_v11 = vsel %vm229_vm3, 1.0, %v583_v9 }
 0x157   : > { %v525_v50 = vpop.eup %524  ;;  %v341_v16 = vsel %vm318_vm6, %v465_v11, 0.0 }
 0x158   : > { %v296_v51 = vmul.f32 0.6931472, %v525_v50  ;;  %v301_v52 = vmul.f32 64.0, %v297_v49  ;;  %v299_v53 = vsub.f32 %v279_v44, %v297_v49 }
 0x15a   : > { %v298_v54 = vadd.f32 %v296_v51, %v242_v15  ;;  %v303_v55 = vsub.f32 %v287_v48, %v301_v52  ;;  %v305_v59 = vmul.f32 0.9, %v299_v53  ;;  %v340_v15 = vsel %vm318_vm6, %v464_v10, 0.0 }
 0x15b   : > { %v342_v18 = vadd.f32 %v341_v16, %v340_v15 }
 0x15c   : > { %v307_v57 = vsub.f32 %v303_v55, %v299_v53  ;;  %v302_v58 = vmul.f32 64.0, %v298_v54  ;;  %v300_v60 = vsub.f32 %v282_v45, %v298_v54 }
 0x15e   : > { %v309_v61 = vmul.f32 0.0015625, %v307_v57  ;;  %v304_v62 = vsub.f32 %v290_v56, %v302_v58  ;;  %v306_v1 = vmul.f32 0.9, %v300_v60 }
 0x160   : > { %v311_v63 = vadd.f32 %v309_v61, %v305_v59  ;;  %v308_v0 = vsub.f32 %v304_v62, %v300_v60 }
 0x162   : > { %v310_v2 = vmul.f32 0.0015625, %v308_v0  ;;  %v313_v4 = vsub.f32 0.0, %v311_v63 }
 0x164   : > { %v312_v5 = vadd.f32 %v310_v2, %v306_v1  ;;  %v316_v8 = vsel %vm228_vm2, %v313_v4, 0.0 }
 0x165   : > { %v319_v13 = vsel %vm318_vm6, %v316_v8, 0.0 }
 0x166   : > { %v314_v7 = vsub.f32 0.0, %v312_v5 }
 0x168   : > { %v317_v12 = vsel %vm229_vm3, %v314_v7, 0.0 }
 0x169   : > { %v320_v14 = vsel %vm318_vm6, %v317_v12, 0.0 }
 0x16a   : > { %v321_v17 = vadd.f32 %v320_v14, %v319_v13 }
 0x16c   : > { %322 = vadd.xlane.f32.xlu0 %v321_v17 }
 0x170   : > { %343 = vadd.xlane.f32.xlu0 %v342_v18 }
 0x1f9   : > { %v323_v19 = vpop.xlane.xlu0 %322 }
 0x1fa   : > { %v324_v21 = vrot.slane %v323_v19, 4 }
 0x1fc   : > { %v325_v22 = vadd.f32 %v324_v21, %v323_v19 }
 0x1fd   : > { %v344_v23 = vpop.xlane.xlu0 %343 }
 0x1fe   : > { %v326_v3 = vrot.slane %v325_v22, 2  ;;  %v345_v24 = vrot.slane %v344_v23, 4 }
 0x200   : > { %v346_v25 = vadd.f32 %v345_v24, %v344_v23  ;;  %v327_v26 = vadd.f32 %v326_v3, %v325_v22 }
 0x202   : > { %v347_v27 = vrot.slane %v346_v25, 2  ;;  %v328_v28 = vrot.slane %v327_v26, 1 }
 0x204   : > { %v348_v6 = vadd.f32 %v347_v27, %v346_v25  ;;  %v329_v29 = vadd.f32 %v328_v28, %v327_v26 }
 0x206   : > { %473 = vpush %v329_v29  ;;  %v349_v30 = vrot.slane %v348_v6, 1 }
 0x208   : > { %v350_v31 = vadd.f32 %v349_v30, %v348_v6 }
 0x20a   : > { %475 = vpush %v350_v31 }
 0x237   : > { %s474_s24 = spop %473 }
 0x238   : > { %v331_v33 = vstv %s474_s24 }
 0x239   : > { %v332_v34 = vadd.f32 %v331_v33, %v315_v32  ;;  %358 = sbr.rel (%p466_p7) target bundleno = 717 (0x2cd), region = 36 }
 0x23b   : > { %334 = vst.msk [vmem:[#allocation2] sm:$0x1] %vm333_vm7, %v332_v34  ;;  %s476_s25 = spop %475 }
 0x23c   : > { %v352_v36 = vstv %s476_s25 }
 0x23d   : > { %v353_v37 = vadd.f32 %v352_v36, %v335_v35 }
 0x23f   : > { %354 = vst.msk [vmem:[#allocation3] sm:$0x1] %vm333_vm7, %v353_v37 }
 0x242   : > { %v467_v40 = vld [vmem:[#allocation2] ss:$0 sm:$0xff] }
 0x246   : > { %v468_v38 = vld [vmem:[#allocation3] ss:$0 sm:$0xff] }
 0x247   : > { %376 = vperm.xlu0 %526, %v468_v38  }
 0x24b   : > { %366 = vperm.xlu0 %526, %v467_v40  }
 0x2c6   : > { %v377_v41 = vpop.permute.xlu0 %376 }
 0x2c7   : > { %v381_v42 = vsel %vm380_vm8, %v377_v41, 0.0 }
 0x2ca   : > { %v367_v43 = vpop.permute.xlu0 %366 }
 0x2cb   : > { %v382_v44 = vsel %vm379_vm9, %v367_v43, %v381_v42 }
 0x2cc   : > { %383 = vst [vmem:[#allocation4] sm:$0xff] %v382_v44 }
 0x2cd PF: > { %p667_p8 = scmp.eq.s32.totalorder %s455_s12, 12  ;;  %s585_s27 = smov [#allocation4]  }
 0x2ce   : > { %s393_s28 = sshll.u32 %s585_s27, 4  ;;  %s394_s28 = int_to_ptr.vmem [resolvable:$true] %s393_s28 }
 0x2cf   : > { %s527_s29 = scalar_lea.vmem %s394_s28, 128  ;;  %p534_p12 = scmp.lt.s32.totalorder %s394_s28, %s394_s28 }
 0x2d0   : > { %p528_p9 = scmp.ne.s32.totalorder %s394_s28, %s527_s29  ;;  %p535_p13 = scmp.lt.s32.totalorder %s527_s29, %s527_s29 }
 0x2d2   : > { %p529_p10 = pnand %p528_p9, %p667_p8  ;;  %p536_p0 = por %p535_p13, %p534_p12 }
 0x2d4   : > { %p530_p11 = pneg %p529_p10 }
 0x2d6   : > { %p537_p1 = pnand %p536_p0, %p530_p11 }
 0x2d8   : > { %540 = shalt.err (!%p537_p1)
}
 0x2d9   : > { %s541_s4 = scalar_lea.hbm %s704_s2, 128 }
 0x2da   : > { %p542_p2 = scmp.ne.s32.totalorder %s704_s2, %s541_s4  ;;  %p547_p5 = scmp.lt.u32.totalorder %s541_s4, %s704_s2 }
 0x2dc   : > { %p543_p3 = pnand %p542_p2, %p667_p8 }
 0x2de   : > { %p544_p4 = pneg %p543_p3 }
 0x2e0   : > { %p549_p6 = pnand %p547_p5, %p544_p4 }
 0x2e2   : > { %552 = shalt.err (!%p549_p6)
}
 0x2e3   : > { %478 = dma.vmem_to_hbm [thread:$0]  (%p667_p8), %s394_s28, 128, %s704_s2, [#allocation5]  }
 0x2e4   : > { %566 = dma.done.wait (%p667_p8), [#allocation5], 128  }
 0x2e5   : > { %568 = vsyncadd (%p667_p8), [#allocation5], 4294967168 }
 0x2e6 PF: > { %s13_s11 = sadd.s32 1, %s579_s11   ;;  %s706_s9 = smov %s575_s10 }
 0x2e7   : > { %p10_p7 = scmp.ge.s32.totalorder %s13_s11, 15   ;;  %s707_s10 = smov %s709_s13 }
 0x2e9   :  { %12 = sbr.rel (!%p10_p7) target bundleno = 2 (0x2), region = 67 }
 0x2f0   :  { %406 = vsyncpa [#allocation5], 1 }
 0x2f1   :  { %408 = vsyncpa [#allocation5 + $0x1], 1 }

</bundles_post_ra>
